<compile_context>
chip_gen: v7x
topology: tpu7x:2x2x1
jax: 0.10.0
libtpu: 0.0.40
codegen_flags: <defaults>
</compile_context>

<pallas_src>
import jax
import jax.numpy as jnp
from jax.experimental import pallas as pl
from jax.experimental.pallas import tpu as pltpu

N_OBSERVATIONS = 4   # CartPole-v1 observation dim
N_ACTIONS = 2        # CartPole-v1 action dim
HIDDEN = 128         # also the lane-dense padded width for input / output


def dqn_kernel(x_ref, w1_ref, w2_ref, w3_ref, b_ref, o_ref):
    # x tile: (tb, 128) f32 (obs features zero-padded to 128 lanes).
    # Cast activations to bf16 for the MXU; bias / ReLU / accumulation stay f32.
    x = x_ref[...].astype(jnp.bfloat16)

    b1 = b_ref[0:1, :]   # (1, 128) f32
    b2 = b_ref[1:2, :]
    b3 = b_ref[2:3, :]

    # layer1 + ReLU  (zero-padded K rows contribute exactly 0)
    h1 = jnp.dot(x, w1_ref[...], preferred_element_type=jnp.float32) + b1
    h1 = jnp.maximum(h1, 0.0)

    # layer2 + ReLU
    h2 = jnp.dot(h1.astype(jnp.bfloat16), w2_ref[...],
                 preferred_element_type=jnp.float32) + b2
    h2 = jnp.maximum(h2, 0.0)

    # layer3 (no activation); output stays lane-dense (tb, 128), padded cols are 0
    out = jnp.dot(h2.astype(jnp.bfloat16), w3_ref[...],
                  preferred_element_type=jnp.float32) + b3
    o_ref[...] = out.astype(o_ref.dtype)


def init_params(key):
    """Deterministic init mimicking nn.Linear defaults (uniform +/- 1/sqrt(fan_in)).
    Weights are stored (in_features, out_features)."""
    def linear_init(key, fan_in, fan_out):
        kw, kb = jax.random.split(key)
        bound = 1.0 / jnp.sqrt(fan_in)
        w = jax.random.uniform(kw, (fan_in, fan_out), jnp.float32, -bound, bound)
        b = jax.random.uniform(kb, (1, fan_out), jnp.float32, -bound, bound)
        return w, b

    k1, k2, k3 = jax.random.split(key, 3)
    w1, b1 = linear_init(k1, N_OBSERVATIONS, HIDDEN)
    w2, b2 = linear_init(k2, HIDDEN, HIDDEN)
    w3, b3 = linear_init(k3, HIDDEN, N_ACTIONS)
    return w1, b1, w2, b2, w3, b3


def prepare_params(params):
    """One-time pad/cast of (in,out)-layout f32 params for the kernel.

    W1 -> (128,128) bf16 (obs rows zero-padded), W2 -> (128,128) bf16,
    W3 -> (128,128) bf16 (action cols zero-padded), biases packed into a single
    (3,128) f32 array (b3 zero-padded, so the [:, :N_ACTIONS] slice stays exact)."""
    w1, b1, w2, b2, w3, b3 = params
    d = HIDDEN
    w1p = jnp.zeros((d, d), jnp.float32).at[: w1.shape[0], :].set(w1)
    w3p = jnp.zeros((d, d), jnp.float32).at[:, : w3.shape[1]].set(w3)
    b3p = jnp.zeros((1, d), jnp.float32).at[:, : w3.shape[1]].set(b3.reshape(1, -1))
    bias = jnp.concatenate([b1.reshape(1, d), b2.reshape(1, d), b3p], axis=0)
    return (w1p.astype(jnp.bfloat16),
            w2.astype(jnp.bfloat16),
            w3p.astype(jnp.bfloat16),
            bias)


def dqn_forward(x, prepared, n_actions=N_ACTIONS, block_b=None):
    w1p, w2p, w3p, bias = prepared
    B = x.shape[0]
    d = HIDDEN

    # Batch tile: multiple of 8 sublanes; capped so double-buffered x/out tiles
    # stay tiny even for big eval batches.
    if block_b is None:
        block_b = 256 if B >= 256 else max(8, ((B + 7) // 8) * 8)
    n_tiles = pl.cdiv(B, block_b)
    b_pad = n_tiles * block_b

    # Lane-dense, sublane-padded input: (b_pad, 128) f32, zeros elsewhere.
    xp = jnp.zeros((b_pad, d), jnp.float32).at[:B, : x.shape[1]].set(
        x.astype(jnp.float32))

    pinned = lambda shape: pl.BlockSpec(shape, lambda i: (0, 0))

    out = pl.pallas_call(
        dqn_kernel,
        out_shape=jax.ShapeDtypeStruct((b_pad, d), jnp.float32),
        grid=(n_tiles,),
        in_specs=[
            pl.BlockSpec((block_b, d), lambda i: (i, 0)),    # x: tiled over batch
            pinned((d, d)), pinned((d, d)), pinned((d, d)),  # weights stay resident
            pinned((3, d)),                                  # packed biases
        ],
        out_specs=pl.BlockSpec((block_b, d), lambda i: (i, 0)),
        compiler_params=pltpu.CompilerParams(
            dimension_semantics=("parallel",),  # batch axis -> both v7x TCs
        ),
    )(xp, w1p, w2p, w3p, bias)

    return out[:B, :n_actions]


def reference_forward(x, params):
    """Pure-JAX f32 reference matching the torch module's forward exactly."""
    w1, b1, w2, b2, w3, b3 = params
    h1 = jnp.maximum(x @ w1 + b1, 0.0)
    h2 = jnp.maximum(h1 @ w2 + b2, 0.0)
    return h2 @ w3 + b3


if __name__ == "__main__":
    key = jax.random.PRNGKey(0)
    kp, kx = jax.random.split(key)

    params = init_params(kp)
    prepared = prepare_params(params)

    batch = 8
    x = jax.random.normal(kx, (batch, N_OBSERVATIONS), jnp.float32)

    out = jax.block_until_ready(dqn_forward(x, prepared))
    ref = jax.block_until_ready(reference_forward(x, params))

    assert out.shape == (batch, N_ACTIONS)
    # bf16 weights / bf16 MXU inputs with f32 accumulation vs f32 reference.
    assert jnp.allclose(out, ref, atol=2e-2, rtol=2e-2), float(jnp.max(jnp.abs(out - ref)))
    print("KERNEL_OK")
</pallas_src>

<mosaic_0001>
module attributes {stable_mosaic.version = 11 : i64} {
  func.func @dqn_kernel(%arg0: i32, %arg1: memref<8x128xf32, #tpu.memory_space<vmem>>, %arg2: memref<128x128xbf16, #tpu.memory_space<vmem>>, %arg3: memref<128x128xbf16, #tpu.memory_space<vmem>>, %arg4: memref<128x128xbf16, #tpu.memory_space<vmem>>, %arg5: memref<3x128xf32, #tpu.memory_space<vmem>>, %arg6: memref<8x128xf32, #tpu.memory_space<vmem>>) attributes {dimension_semantics = [#tpu.dimension_semantics<parallel>], iteration_bounds = array<i64: 1>, scalar_prefetch = 0 : i64, scratch_operands = 0 : i64, tpu.core_type = #tpu.core_type<tc>, window_params = [{transform_indices = @transform_0, window_bounds = array<i64: 8, 128>}, {pipeline_mode = #tpu.pipeline_mode<synchronous>, transform_indices = @transform_1, window_bounds = array<i64: 128, 128>}, {pipeline_mode = #tpu.pipeline_mode<synchronous>, transform_indices = @transform_2, window_bounds = array<i64: 128, 128>}, {pipeline_mode = #tpu.pipeline_mode<synchronous>, transform_indices = @transform_3, window_bounds = array<i64: 128, 128>}, {pipeline_mode = #tpu.pipeline_mode<synchronous>, transform_indices = @transform_4, window_bounds = array<i64: 3, 128>}, {transform_indices = @transform_5, window_bounds = array<i64: 8, 128>}]} {
    %c0 = arith.constant 0 : index
    %c0_0 = arith.constant 0 : index
    %0 = vector.load %arg1[%c0, %c0_0] : memref<8x128xf32, #tpu.memory_space<vmem>>, vector<8x128xf32>
    %1 = arith.truncf %0 : vector<8x128xf32> to vector<8x128xbf16>
    %c0_1 = arith.constant 0 : index
    %c0_2 = arith.constant 0 : index
    %2 = vector.load %arg5[%c0_1, %c0_2] : memref<3x128xf32, #tpu.memory_space<vmem>>, vector<1x128xf32>
    %c1 = arith.constant 1 : index
    %c0_3 = arith.constant 0 : index
    %3 = vector.load %arg5[%c1, %c0_3] : memref<3x128xf32, #tpu.memory_space<vmem>>, vector<1x128xf32>
    %c2 = arith.constant 2 : index
    %c0_4 = arith.constant 0 : index
    %4 = vector.load %arg5[%c2, %c0_4] : memref<3x128xf32, #tpu.memory_space<vmem>>, vector<1x128xf32>
    %c0_5 = arith.constant 0 : index
    %c0_6 = arith.constant 0 : index
    %5 = vector.load %arg2[%c0_5, %c0_6] : memref<128x128xbf16, #tpu.memory_space<vmem>>, vector<128x128xbf16>
    %cst = arith.constant dense<0.000000e+00> : vector<8x128xf32>
    %6 = tpu.matmul %1, %5, %cst {dimension_numbers = #tpu.dot_dimension_numbers<[1], [0], [0], [1], [0, 0, 1, 1], [], []>} : vector<8x128xbf16>, vector<128x128xbf16>, vector<8x128xf32> -> vector<8x128xf32>
    %7 = vector.broadcast %2 : vector<1x128xf32> to vector<8x128xf32>
    %8 = arith.addf %6, %7 : vector<8x128xf32>
    %cst_7 = arith.constant 0.000000e+00 : f32
    %9 = vector.broadcast %cst_7 : f32 to vector<8x128xf32>
    %10 = arith.maximumf %8, %9 : vector<8x128xf32>
    %11 = arith.truncf %10 : vector<8x128xf32> to vector<8x128xbf16>
    %c0_8 = arith.constant 0 : index
    %c0_9 = arith.constant 0 : index
    %12 = vector.load %arg3[%c0_8, %c0_9] : memref<128x128xbf16, #tpu.memory_space<vmem>>, vector<128x128xbf16>
    %cst_10 = arith.constant dense<0.000000e+00> : vector<8x128xf32>
    %13 = tpu.matmul %11, %12, %cst_10 {dimension_numbers = #tpu.dot_dimension_numbers<[1], [0], [0], [1], [0, 0, 1, 1], [], []>} : vector<8x128xbf16>, vector<128x128xbf16>, vector<8x128xf32> -> vector<8x128xf32>
    %14 = vector.broadcast %3 : vector<1x128xf32> to vector<8x128xf32>
    %15 = arith.addf %13, %14 : vector<8x128xf32>
    %cst_11 = arith.constant 0.000000e+00 : f32
    %16 = vector.broadcast %cst_11 : f32 to vector<8x128xf32>
    %17 = arith.maximumf %15, %16 : vector<8x128xf32>
    %18 = arith.truncf %17 : vector<8x128xf32> to vector<8x128xbf16>
    %c0_12 = arith.constant 0 : index
    %c0_13 = arith.constant 0 : index
    %19 = vector.load %arg4[%c0_12, %c0_13] : memref<128x128xbf16, #tpu.memory_space<vmem>>, vector<128x128xbf16>
    %cst_14 = arith.constant dense<0.000000e+00> : vector<8x128xf32>
    %20 = tpu.matmul %18, %19, %cst_14 {dimension_numbers = #tpu.dot_dimension_numbers<[1], [0], [0], [1], [0, 0, 1, 1], [], []>} : vector<8x128xbf16>, vector<128x128xbf16>, vector<8x128xf32> -> vector<8x128xf32>
    %21 = vector.broadcast %4 : vector<1x128xf32> to vector<8x128xf32>
    %22 = arith.addf %20, %21 : vector<8x128xf32>
    %c0_15 = arith.constant 0 : index
    %c0_16 = arith.constant 0 : index
    %23 = vector.load %arg6[%c0_15, %c0_16] : memref<8x128xf32, #tpu.memory_space<vmem>>, vector<8x128xf32>
    tpu.vector_store %arg6[%c0_15, %c0_16], %22 {strides = array<i32>} : memref<8x128xf32, #tpu.memory_space<vmem>>, vector<8x128xf32>,
    return
  }
  func.func @transform_0(%arg0: i32) -> (i32, i32) {
    %c0_i32 = arith.constant 0 : i32
    %c0_i32_0 = arith.constant 0 : i32
    return %arg0, %c0_i32 : i32, i32
  }
  func.func @transform_1(%arg0: i32) -> (i32, i32) {
    %c0_i32 = arith.constant 0 : i32
    %c0_i32_0 = arith.constant 0 : i32
    %c0_i32_1 = arith.constant 0 : i32
    return %c0_i32, %c0_i32_0 : i32, i32
  }
  func.func @transform_2(%arg0: i32) -> (i32, i32) {
    %c0_i32 = arith.constant 0 : i32
    %c0_i32_0 = arith.constant 0 : i32
    %c0_i32_1 = arith.constant 0 : i32
    return %c0_i32, %c0_i32_0 : i32, i32
  }
  func.func @transform_3(%arg0: i32) -> (i32, i32) {
    %c0_i32 = arith.constant 0 : i32
    %c0_i32_0 = arith.constant 0 : i32
    %c0_i32_1 = arith.constant 0 : i32
    return %c0_i32, %c0_i32_0 : i32, i32
  }
  func.func @transform_4(%arg0: i32) -> (i32, i32) {
    %c0_i32 = arith.constant 0 : i32
    %c0_i32_0 = arith.constant 0 : i32
    %c0_i32_1 = arith.constant 0 : i32
    return %c0_i32, %c0_i32_0 : i32, i32
  }
  func.func @transform_5(%arg0: i32) -> (i32, i32) {
    %c0_i32 = arith.constant 0 : i32
    %c0_i32_0 = arith.constant 0 : i32
    return %arg0, %c0_i32 : i32, i32
  }
}

</mosaic_0001>

<bundles_post_ra>
// kernel: tpu_custom_call.1
= control target key start
LH: loop header
LB: loop body
LE: loop exit
PB: predicated region body
PF: predicated region fallthrough
CT: control target
= control target key end

     0   :  { %10 = vsyncpa [#allocation3], 0  ;;  %s838_s0 = inlined_call_operand.hbm [shape: f32[8,128], index: 0, kind: input, shape index: {}]   ;;  %s839_s1 = inlined_call_operand.hbm [shape: bf16[128,128], index: 1, kind: input, shape index: {}]   ;;  %s840_s2 = inlined_call_operand.hbm [shape: bf16[128,128], index: 2, kind: input, shape index: {}]   ;;  %s841_s3 = inlined_call_operand.hbm [shape: bf16[128,128], index: 3, kind: input, shape index: {}]   ;;  %s842_s4 = inlined_call_operand.vmem [shape: f32[3,128], index: 4, kind: input, shape index: {}]   ;;  %s843_s5 = inlined_call_operand.hbm [shape: f32[8,128], index: 5, kind: output, shape index: {}]  }
   0x1   :  { %11 = vsyncpa [#allocation6], 0 }
   0x2   :  { %12 = vsyncpa [#allocation9], 0 }
   0x3   :  { %13 = vsyncpa [#allocation4], 0  ;;  %s691_s18 = smov [#allocation5]   ;;  %s573_s22 = scalar_lea.hbm %s839_s1, 1024 }
   0x4   :  { %s29_s19 = sshll.u32 %s691_s18, 4  ;;  %p574_p0 = scmp.ne.s32.totalorder %s839_s1, %s573_s22  ;;  %s30_s19 = int_to_ptr.vmem [resolvable:$true] %s29_s19 }
   0x5   :  { %p577_p1 = scmp.lt.u32.totalorder %s573_s22, %s839_s1 }
   0x7   :  { %p579_p2 = pnand %p577_p1, %p574_p0 }
   0x9   :  { %582 = shalt.err (!%p579_p2)
}
   0xa   :  { %s583_s27 = scalar_lea.vmem %s30_s19, 1024  ;;  %p588_p4 = scmp.lt.s32.totalorder %s30_s19, %s30_s19 }
   0xb   :  { %p584_p3 = scmp.ne.s32.totalorder %s30_s19, %s583_s27  ;;  %p589_p5 = scmp.lt.s32.totalorder %s583_s27, %s583_s27 }
   0xd   :  { %p590_p6 = por %p589_p5, %p588_p4 }
   0xf   :  { %p591_p7 = pnand %p590_p6, %p584_p3 }
  0x11   :  { %594 = shalt.err (!%p591_p7)
}
  0x12   :  { %s692_s28 = smov 64   ;;  %s693_s29 = smov 4  }
  0x13   :  { %35 = dma.hbm_to_vmem [thread:$0]  %s839_s1, 1024, %s30_s19, [#allocation6], %s692_s28, %s692_s28, %s693_s29  }
  0x14   :  { %s694_s7 = smov [#allocation2]   ;;  %s695_s9 = smov [#allocation7]  }
  0x15   :  { %s20_s8 = sshll.u32 %s694_s7, 4  ;;  %s41_s10 = sshll.u32 %s695_s9, 4  ;;  %s21_s8 = int_to_ptr.vmem [resolvable:$true] %s20_s8  ;;  %s42_s10 = int_to_ptr.vmem [resolvable:$true] %s41_s10 }
  0x16   :  { %s595_s13 = scalar_lea.hbm %s838_s0, 128 }
  0x17   :  { %p596_p8 = scmp.ne.s32.totalorder %s838_s0, %s595_s13  ;;  %p599_p9 = scmp.lt.u32.totalorder %s595_s13, %s838_s0 }
  0x19   :  { %p601_p10 = pnand %p599_p9, %p596_p8 }
  0x1b   :  { %604 = shalt.err (!%p601_p10)
}
  0x1c   :  { %s605_s1 = scalar_lea.vmem %s21_s8, 128  ;;  %p610_p12 = scmp.lt.s32.totalorder %s21_s8, %s21_s8 }
  0x1d   :  { %p606_p11 = scmp.ne.s32.totalorder %s21_s8, %s605_s1  ;;  %p611_p13 = scmp.lt.s32.totalorder %s605_s1, %s605_s1 }
  0x1f   :  { %p612_p0 = por %p611_p13, %p610_p12 }
  0x21   :  { %p613_p1 = pnand %p612_p0, %p606_p11 }
  0x23   :  { %616 = shalt.err (!%p613_p1)
}
  0x24   :  { %23 = dma.hbm_to_vmem [thread:$0]  %s838_s0, 128, %s21_s8, [#allocation3]  }
  0x25   :  { %s617_s22 = scalar_lea.hbm %s840_s2, 1024 }
  0x26   :  { %p618_p2 = scmp.ne.s32.totalorder %s840_s2, %s617_s22  ;;  %p621_p3 = scmp.lt.u32.totalorder %s617_s22, %s840_s2 }
  0x28   :  { %p623_p4 = pnand %p621_p3, %p618_p2 }
  0x2a   :  { %626 = shalt.err (!%p623_p4)
}
  0x2b   :  { %s627_s27 = scalar_lea.vmem %s42_s10, 1024  ;;  %p632_p6 = scmp.lt.s32.totalorder %s42_s10, %s42_s10 }
  0x2c   :  { %p628_p5 = scmp.ne.s32.totalorder %s42_s10, %s627_s27  ;;  %p633_p7 = scmp.lt.s32.totalorder %s627_s27, %s627_s27 }
  0x2e   :  { %p634_p8 = por %p633_p7, %p632_p6 }
  0x30   :  { %p635_p9 = pnand %p634_p8, %p628_p5 }
  0x32   :  { %638 = shalt.err (!%p635_p9)
}
  0x33   :  { %47 = dma.hbm_to_vmem [thread:$0]  %s840_s2, 1024, %s42_s10, [#allocation6], %s692_s28, %s692_s28, %s693_s29  }
  0x34   :  { %s696_s6 = smov [#allocation8]   ;;  %s639_s11 = scalar_lea.hbm %s841_s3, 1024 }
  0x35   :  { %s53_s7 = sshll.u32 %s696_s6, 4  ;;  %p640_p10 = scmp.ne.s32.totalorder %s841_s3, %s639_s11  ;;  %s54_s7 = int_to_ptr.vmem [resolvable:$true] %s53_s7 }
  0x36   :  { %p643_p11 = scmp.lt.u32.totalorder %s639_s11, %s841_s3 }
  0x38   :  { %p645_p12 = pnand %p643_p11, %p640_p10 }
  0x3a   :  { %648 = shalt.err (!%p645_p12)
}
  0x3b   :  { %s649_s16 = scalar_lea.vmem %s54_s7, 1024  ;;  %p654_p0 = scmp.lt.s32.totalorder %s54_s7, %s54_s7 }
  0x3c   :  { %p650_p13 = scmp.ne.s32.totalorder %s54_s7, %s649_s16  ;;  %p655_p1 = scmp.lt.s32.totalorder %s649_s16, %s649_s16 }
  0x3e   :  { %p656_p2 = por %p655_p1, %p654_p0 }
  0x40   :  { %p657_p3 = pnand %p656_p2, %p650_p13 }
  0x42   :  { %660 = shalt.err (!%p657_p3)
}
  0x43   :  { %59 = dma.hbm_to_vmem [thread:$0]  %s841_s3, 1024, %s54_s7, [#allocation9], %s692_s28, %s692_s28, %s693_s29  }
  0x44   :  { %683 = dma.done.wait [#allocation3], 128  }
  0x45   :  { %684 = vsyncadd [#allocation3], 4294967168 }
  0x46   :  { %685 = dma.done.wait [#allocation6], 2048  }
  0x47   :  { %686 = vsyncadd [#allocation6], 4294965248 }
  0x48   :  { %687 = dma.done.wait [#allocation9], 1024  }
  0x49   :  { %688 = vsyncadd [#allocation9], 4294966272  ;;  %v697_v0 = vmov 0.0   ;;  %vm698_vm0 = vmmov 0   ;;  %v549_v1 = vld [vmem:[#allocation5] sm:$0xff]   ;;  %v550_v2 = vld [vmem:[#allocation5 + $0x8] sm:$0xff]  }
  0x4a   :  { %480 = vmatprep.subr.bf16.mxu0 %v697_v0  ;;  %496 = vmatprep.mubr.msk.bf16.mxu0 %vm698_vm0, %v697_v0  ;;  %v551_v3 = vld [vmem:[#allocation5 + $0x10] sm:$0xff]   ;;  %v557_v4 = vld [vmem:[#allocation7] sm:$0xff]   ;;  %v552_v5 = vld [vmem:[#allocation5 + $0x18] sm:$0xff]   ;;  %s699_s19 = smov [#allocation10]  }
  0x4b   :  { %500 = vmatprep.subr.bf16.mxu1 %v697_v0  ;;  %516 = vmatprep.mubr.msk.bf16.mxu1 %vm698_vm0, %v697_v0  ;;  %v558_v6 = vld [vmem:[#allocation7 + $0x8] sm:$0xff]   ;;  %v553_v7 = vld [vmem:[#allocation5 + $0x20] sm:$0xff]   ;;  %v559_v8 = vld [vmem:[#allocation7 + $0x10] sm:$0xff]   ;;  %s415_s20 = sshll.u32 %s699_s19, 4  ;;  %s416_s20 = int_to_ptr.vmem [resolvable:$true] %s415_s20 }
  0x4c   :  { %481 = vmatpush3.bf16.msra.mxu0 %v549_v1  ;;  %501 = vmatpush3.bf16.msra.mxu1 %v557_v4  ;;  %v554_v9 = vld [vmem:[#allocation5 + $0x28] sm:$0xff]   ;;  %v560_v10 = vld [vmem:[#allocation7 + $0x18] sm:$0xff]   ;;  %v555_v11 = vld [vmem:[#allocation5 + $0x30] sm:$0xff]   ;;  %s661_s21 = scalar_lea.vmem %s416_s20, 128  ;;  %p666_p5 = scmp.lt.s32.totalorder %s416_s20, %s416_s20 }
  0x4d   :  { %482 = vmatprep.subr.bf16.mxu0 %v697_v0  ;;  %502 = vmatprep.subr.bf16.mxu1 %v697_v0  ;;  %v561_v12 = vld [vmem:[#allocation7 + $0x20] sm:$0xff]   ;;  %v556_v13 = vld [vmem:[#allocation5 + $0x38] sm:$0xff]   ;;  %v562_v15 = vld [vmem:[#allocation7 + $0x28] sm:$0xff]   ;;  %p662_p4 = scmp.ne.s32.totalorder %s416_s20, %s661_s21  ;;  %p667_p6 = scmp.lt.s32.totalorder %s661_s21, %s661_s21 }
  0x4e   :  { %v75_v14 = vld [vmem:[#allocation2] sm:$0xff]  ;;  %v563_v17 = vld [vmem:[#allocation7 + $0x30] sm:$0xff]   ;;  %v565_v19 = vld [vmem:[#allocation8] sm:$0xff]  }
  0x4f   :  { %v76_v16 = vpack.c.bf16 %v75_v14, %v75_v14  ;;  %v564_v18 = vld [vmem:[#allocation7 + $0x38] sm:$0xff]   ;;  %v566_v20 = vld [vmem:[#allocation8 + $0x8] sm:$0xff]   ;;  %v567_v21 = vld [vmem:[#allocation8 + $0x10] sm:$0xff]   ;;  %p668_p7 = por %p667_p6, %p666_p5 }
  0x50   :  { %483 = vmatpush3.bf16.msra.mxu0 %v550_v2  ;;  %503 = vmatpush3.bf16.msra.mxu1 %v558_v6  ;;  %v568_v22 = vld [vmem:[#allocation8 + $0x18] sm:$0xff]   ;;  %v569_v23 = vld [vmem:[#allocation8 + $0x20] sm:$0xff]   ;;  %v570_v24 = vld [vmem:[#allocation8 + $0x28] sm:$0xff]  }
  0x51   :  { %484 = vmatprep.subr.bf16.mxu0 %v697_v0  ;;  %504 = vmatprep.subr.bf16.mxu1 %v697_v0  ;;  %v426_v25 = vld [vmem:[%s842_s4] ss:$0 sm:$0xff]  ;;  %v571_v33 = vld [vmem:[#allocation8 + $0x30] sm:$0xff]   ;;  %v435_v35 = vld [vmem:[%s842_s4 + $0x1] ss:$0 sm:$0xff]  ;;  %p669_p8 = pnand %p668_p7, %p662_p4 }
  0x52   :  { %v572_v34 = vld [vmem:[#allocation8 + $0x38] sm:$0xff]  }
  0x53   :  { %v444_v43 = vld [vmem:[%s842_s4 + $0x2] ss:$0 sm:$0xff] }
  0x54   :  { %485 = vmatpush3.bf16.msra.mxu0 %v551_v3  ;;  %505 = vmatpush3.bf16.msra.mxu1 %v559_v8 }
  0x55   :  { %486 = vmatprep.subr.bf16.mxu0 %v697_v0  ;;  %506 = vmatprep.subr.bf16.mxu1 %v697_v0 }
  0x58   :  { %487 = vmatpush3.bf16.msra.mxu0 %v552_v5  ;;  %507 = vmatpush3.bf16.msra.mxu1 %v560_v10 }
  0x59   :  { %488 = vmatprep.subr.bf16.mxu0 %v697_v0  ;;  %508 = vmatprep.subr.bf16.mxu1 %v697_v0 }
  0x5c   :  { %489 = vmatpush3.bf16.msra.mxu0 %v553_v7  ;;  %509 = vmatpush3.bf16.msra.mxu1 %v561_v12 }
  0x5d   :  { %490 = vmatprep.subr.bf16.mxu0 %v697_v0  ;;  %510 = vmatprep.subr.bf16.mxu1 %v697_v0 }
  0x60   :  { %491 = vmatpush3.bf16.msra.mxu0 %v554_v9  ;;  %511 = vmatpush3.bf16.msra.mxu1 %v562_v15 }
  0x61   :  { %492 = vmatprep.subr.bf16.mxu0 %v697_v0  ;;  %512 = vmatprep.subr.bf16.mxu1 %v697_v0 }
  0x64   :  { %493 = vmatpush3.bf16.msra.mxu0 %v555_v11  ;;  %513 = vmatpush3.bf16.msra.mxu1 %v563_v17 }
  0x65   :  { %494 = vmatprep.subr.bf16.mxu0 %v697_v0  ;;  %514 = vmatprep.subr.bf16.mxu1 %v697_v0 }
  0x68   :  { %495 = vmatpush3.bf16.msra.mxu0 %v556_v13  ;;  %515 = vmatpush3.bf16.msra.mxu1 %v564_v18 }
  0x69   :  { %520 = vmatprep.subr.bf16.mxu0 %v697_v0 }
  0x6b   :  { %497 = vmatmul.mubr.bf16.vlgmr.msra.gmra.mrb[0].mxu0 %v76_v16 }
  0x6c   :  { %536 = vmatprep.mubr.msk.bf16.mxu0 %vm698_vm0, %v697_v0  ;;  %521 = vmatpush3.bf16.msra.mxu0 %v565_v19 }
  0x6d   :  { %522 = vmatprep.subr.bf16.mxu0 %v697_v0 }
  0x70   :  { %523 = vmatpush3.bf16.msra.mxu0 %v566_v20 }
  0x71   :  { %524 = vmatprep.subr.bf16.mxu0 %v697_v0 }
  0x74   :  { %525 = vmatpush3.bf16.msra.mxu0 %v567_v21 }
  0x75   :  { %526 = vmatprep.subr.bf16.mxu0 %v697_v0 }
  0x78   :  { %527 = vmatpush3.bf16.msra.mxu0 %v568_v22 }
  0x79   :  { %528 = vmatprep.subr.bf16.mxu0 %v697_v0 }
  0x7c   :  { %529 = vmatpush3.bf16.msra.mxu0 %v569_v23 }
  0x7d   :  { %530 = vmatprep.subr.bf16.mxu0 %v697_v0 }
  0x80   :  { %531 = vmatpush3.bf16.msra.mxu0 %v570_v24 }
  0x81   :  { %532 = vmatprep.subr.bf16.mxu0 %v697_v0 }
  0x84   :  { %533 = vmatpush3.bf16.msra.mxu0 %v571_v33 }
  0x85   :  { %534 = vmatprep.subr.bf16.mxu0 %v697_v0 }
  0x88   :  { %535 = vmatpush3.bf16.msra.mxu0 %v572_v34 }
 0x13e   :  { %v182_v26 = vpop.f32.mrb[0].mxu0 }
 0x13f   :  { %v183_v27 = vadd.f32 %v426_v25, %v182_v26  ;;  %v498_v28 = vpop.f32.mrb[1].mxu0 }
 0x140   :  { %v185_v29 = vpop.f32.mrb[2].mxu0 }
 0x141   :  { %v188_v30 = vmax.f32 %v183_v27, 0.0  ;;  %v499_v31 = vpop.f32.mrb[3].mxu0 }
 0x143   :  { %v189_v32 = vpack.c.bf16 %v188_v30, %v188_v30 }
 0x145   :  { %517 = vmatmul.mubr.bf16.vlgmr.msra.gmra.mrb[0].mxu1 %v189_v32 }
 0x218   :  { %v292_v36 = vpop.f32.mrb[0].mxu1 }
 0x219   :  { %v293_v37 = vadd.f32 %v435_v35, %v292_v36  ;;  %v518_v38 = vpop.f32.mrb[1].mxu1 }
 0x21a   :  { %v295_v39 = vpop.f32.mrb[2].mxu1 }
 0x21b   :  { %v298_v40 = vmax.f32 %v293_v37, 0.0  ;;  %v519_v41 = vpop.f32.mrb[3].mxu1 }
 0x21d   :  { %v299_v42 = vpack.c.bf16 %v298_v40, %v298_v40 }
 0x21f   :  { %537 = vmatmul.mubr.bf16.vlgmr.msra.gmra.mrb[4].mxu0 %v299_v42 }
 0x2f2   :  { %v402_v44 = vpop.f32.mrb[4].mxu0 }
 0x2f3   :  { %v403_v45 = vadd.f32 %v444_v43, %v402_v44  ;;  %v538_v46 = vpop.f32.mrb[5].mxu0 }
 0x2f4   :  { %v405_v47 = vpop.f32.mrb[6].mxu0 }
 0x2f5   :  { %408 = vst [vmem:[#allocation10] sm:$0xff] %v403_v45  ;;  %v539_v48 = vpop.f32.mrb[7].mxu0 }
 0x2f6   :  { %672 = shalt.err (!%p669_p8)
}
 0x2f7   :  { %s673_s4 = scalar_lea.hbm %s843_s5, 128 }
 0x2f8   :  { %p674_p9 = scmp.ne.s32.totalorder %s843_s5, %s673_s4  ;;  %p677_p10 = scmp.lt.u32.totalorder %s673_s4, %s843_s5 }
 0x2fa   :  { %p679_p11 = pnand %p677_p10, %p674_p9 }
 0x2fc   :  { %682 = shalt.err (!%p679_p11)
}
 0x2fd   :  { %418 = dma.vmem_to_hbm [thread:$0]  %s416_s20, 128, %s843_s5, [#allocation4]  }
 0x2fe   :  { %689 = dma.done.wait [#allocation4], 128  }
 0x2ff   :  { %690 = vsyncadd [#allocation4], 4294967168 }
 0x300   :  { %422 = vsyncpa [#allocation3], 1 }
 0x301   :  { %423 = vsyncpa [#allocation6], 1 }
 0x302   :  { %424 = vsyncpa [#allocation9], 1 }
 0x303   :  { %425 = vsyncpa [#allocation4], 1 }

</bundles_post_ra>
